<compile_context>
chip_gen: v7x
topology: tpu7x:2x2x1
jax: 0.10.0
libtpu: 0.0.40
codegen_flags: <defaults>
</compile_context>

<pallas_src>
import functools

import numpy as np
import jax
import jax.numpy as jnp
from jax.experimental import pallas as pl
from jax.experimental.pallas import tpu as pltpu  # noqa: F401  (TPU backend)


# ----------------------------------------------------------------------------
# Fused MLP kernel: all layers in one pallas_call, activations stay in VMEM.
# refs layout: (x_ref, W0, b0, W1, b1, ..., W_{L-1}, b_{L-1}, o_ref)
# ----------------------------------------------------------------------------
def _mlp_fused_kernel(*refs, activations, out_valid):
    n_layers = len(activations)
    x_ref = refs[0]
    o_ref = refs[1 + 2 * n_layers]

    h = x_ref[...]                                      # (Bp, Din_p) f32
    for li, act in enumerate(activations):
        w = refs[1 + 2 * li][...]                       # (Din_p, Dout_p)
        b = refs[2 + 2 * li][...]                       # (1, Dout_p)
        y = jnp.dot(h, w, preferred_element_type=jnp.float32) + b
        if act == "linear":
            pass
        elif act == "relu":
            y = jnp.maximum(y, 0.0)
        elif act == "tanh":
            y = jnp.tanh(y)
        elif act == "sigmoid":
            y = jax.nn.sigmoid(y)
        elif act == "softmax":
            # torch F.softmax with no dim -> dim=1 for 2-D input (last axis).
            # Mask padded lanes so they contribute nothing.
            col = jax.lax.broadcasted_iota(jnp.int32, y.shape, dimension=1)
            valid = col < out_valid
            ym = jnp.where(valid, y, -jnp.inf)
            m = jnp.max(ym, axis=-1, keepdims=True)
            e = jnp.where(valid, jnp.exp(ym - m), 0.0)
            denom = jnp.sum(e, axis=-1, keepdims=True)
            y = e * pl.reciprocal(denom, approx=True)   # EUP vrcp, free slot
        h = y
    o_ref[...] = h.astype(o_ref.dtype)


# ----------------------------------------------------------------------------
# Wrapper: pad params once, build one fused pallas_call per forward.
# ----------------------------------------------------------------------------
def _round_up(x, m):
    return ((x + m - 1) // m) * m


def init_feedforward_params(input_size, depth, hidden_sizes, output_size):
    """Mirrors the PyTorch module exactly: each DenseLayer re-seeds 137
    under init='autograder'."""
    if depth - len(hidden_sizes) != 1:
        raise ValueError("depth must be 1 larger than len(hidden_sizes)")
    layer_in = [input_size] + list(hidden_sizes)
    layer_out = list(hidden_sizes) + [output_size]
    params = []
    for din, dout in zip(layer_in, layer_out):
        np.random.seed(137)  # matches DenseLayer(init='autograder')
        W = np.random.random_sample((din, dout)).astype(np.float32)
        b = np.random.random_sample((dout,)).astype(np.float32)
        params.append((jnp.asarray(W), jnp.asarray(b)))
    return params


def prepare_padded_params(params):
    """Zero-pad every (W, b) to lane-dense (mult-of-128) shapes, ONCE."""
    padded = []
    for W, b in params:
        din, dout = W.shape
        din_p = _round_up(din, 128)
        dout_p = _round_up(dout, 128)
        Wp = jnp.zeros((din_p, dout_p), jnp.float32).at[:din, :dout].set(W)
        bp = jnp.zeros((1, dout_p), jnp.float32).at[:, :dout].set(
            b.reshape(1, dout))
        padded.append((Wp, bp))
    return padded


@functools.partial(jax.jit, static_argnames=("activations", "output_size"))
def feedforward_forward(x, padded_params, activations, output_size):
    B, Din = x.shape
    Bp = _round_up(max(B, 8), 8)          # sublane-aligned batch
    Din_p = padded_params[0][0].shape[0]
    Dout_p = padded_params[-1][0].shape[1]

    xp = jnp.zeros((Bp, Din_p), jnp.float32).at[:B, :Din].set(x)

    inputs = [xp]
    in_specs = [pl.BlockSpec((Bp, Din_p), lambda: (0, 0))]
    for Wp, bp in padded_params:
        inputs += [Wp, bp]
        in_specs += [
            pl.BlockSpec(Wp.shape, lambda: (0, 0)),
            pl.BlockSpec(bp.shape, lambda: (0, 0)),
        ]

    kernel = functools.partial(
        _mlp_fused_kernel, activations=tuple(activations), out_valid=output_size)

    out_p = pl.pallas_call(
        kernel,
        out_shape=jax.ShapeDtypeStruct((Bp, Dout_p), jnp.float32),
        in_specs=in_specs,
        out_specs=pl.BlockSpec((Bp, Dout_p), lambda: (0, 0)),
    )(*inputs)

    return out_p[:B, :output_size]


def feedforward(x, params, task_type):
    activations = ("tanh",) * (len(params) - 1) + (
        ("linear",) if task_type == "regression" else ("softmax",))
    padded = prepare_padded_params(params)
    output_size = params[-1][0].shape[1]
    return feedforward_forward(x, padded, activations, output_size)


# ----------------------------------------------------------------------------
# Pure-JAX reference for correctness checking
# ----------------------------------------------------------------------------
def feedforward_ref(x, params, task_type):
    acts = ["tanh"] * (len(params) - 1)
    acts.append("linear" if task_type == "regression" else "softmax")
    out = x
    for (W, b), act in zip(params, acts):
        out = out @ W + b
        if act == "tanh":
            out = jnp.tanh(out)
        elif act == "softmax":
            out = jax.nn.softmax(out, axis=-1)
    return out


if __name__ == "__main__":
    key = jax.random.PRNGKey(0)
    batch = 2
    input_size = 8
    depth = 3
    hidden_sizes = [32, 16]

    x = jax.random.normal(key, (batch, input_size), dtype=jnp.float32)

    # --- regression head (linear output) ---
    params_r = init_feedforward_params(input_size, depth, hidden_sizes, 1)
    out_r = jax.block_until_ready(feedforward(x, params_r, "regression"))
    ref_r = feedforward_ref(x, params_r, "regression")
    assert out_r.shape == (batch, 1)
    np.testing.assert_allclose(np.asarray(out_r), np.asarray(ref_r),
                               rtol=1e-5, atol=1e-5)

    # --- classification head (softmax output) ---
    params_c = init_feedforward_params(input_size, depth, hidden_sizes, 3)
    out_c = jax.block_until_ready(feedforward(x, params_c, "classification"))
    ref_c = feedforward_ref(x, params_c, "classification")
    assert out_c.shape == (batch, 3)
    # slightly looser: pl.reciprocal(approx=True) in the softmax denominator
    np.testing.assert_allclose(np.asarray(out_c), np.asarray(ref_c),
                               rtol=1e-3, atol=1e-5)
    np.testing.assert_allclose(np.asarray(out_c).sum(-1), np.ones(batch),
                               rtol=1e-3, atol=1e-5)

    print("KERNEL_OK")
</pallas_src>

<mosaic_0001>
module attributes {stable_mosaic.version = 11 : i64} {
  func.func @_mlp_fused_kernel(%arg0: memref<8x128xf32, #tpu.memory_space<vmem>>, %arg1: memref<128x128xf32, #tpu.memory_space<vmem>>, %arg2: memref<1x128xf32, #tpu.memory_space<vmem>>, %arg3: memref<128x128xf32, #tpu.memory_space<vmem>>, %arg4: memref<1x128xf32, #tpu.memory_space<vmem>>, %arg5: memref<128x128xf32, #tpu.memory_space<vmem>>, %arg6: memref<1x128xf32, #tpu.memory_space<vmem>>, %arg7: memref<8x128xf32, #tpu.memory_space<vmem>>) attributes {dimension_semantics = [], scalar_prefetch = 0 : i64, scratch_operands = 0 : i64, tpu.core_type = #tpu.core_type<tc>} {
    %c0 = arith.constant 0 : index
    %c0_0 = arith.constant 0 : index
    %0 = vector.load %arg0[%c0, %c0_0] : memref<8x128xf32, #tpu.memory_space<vmem>>, vector<8x128xf32>
    %c0_1 = arith.constant 0 : index
    %c0_2 = arith.constant 0 : index
    %1 = vector.load %arg1[%c0_1, %c0_2] : memref<128x128xf32, #tpu.memory_space<vmem>>, vector<128x128xf32>
    %c0_3 = arith.constant 0 : index
    %c0_4 = arith.constant 0 : index
    %2 = vector.load %arg2[%c0_3, %c0_4] : memref<1x128xf32, #tpu.memory_space<vmem>>, vector<1x128xf32>
    %cst = arith.constant dense<0.000000e+00> : vector<8x128xf32>
    %3 = tpu.matmul %0, %1, %cst {dimension_numbers = #tpu.dot_dimension_numbers<[1], [0], [0], [1], [0, 0, 1, 1], [], []>} : vector<8x128xf32>, vector<128x128xf32>, vector<8x128xf32> -> vector<8x128xf32>
    %4 = vector.broadcast %2 : vector<1x128xf32> to vector<8x128xf32>
    %5 = arith.addf %3, %4 : vector<8x128xf32>
    %6 = math.tanh %5 : vector<8x128xf32>
    %c0_5 = arith.constant 0 : index
    %c0_6 = arith.constant 0 : index
    %7 = vector.load %arg3[%c0_5, %c0_6] : memref<128x128xf32, #tpu.memory_space<vmem>>, vector<128x128xf32>
    %c0_7 = arith.constant 0 : index
    %c0_8 = arith.constant 0 : index
    %8 = vector.load %arg4[%c0_7, %c0_8] : memref<1x128xf32, #tpu.memory_space<vmem>>, vector<1x128xf32>
    %cst_9 = arith.constant dense<0.000000e+00> : vector<8x128xf32>
    %9 = tpu.matmul %6, %7, %cst_9 {dimension_numbers = #tpu.dot_dimension_numbers<[1], [0], [0], [1], [0, 0, 1, 1], [], []>} : vector<8x128xf32>, vector<128x128xf32>, vector<8x128xf32> -> vector<8x128xf32>
    %10 = vector.broadcast %8 : vector<1x128xf32> to vector<8x128xf32>
    %11 = arith.addf %9, %10 : vector<8x128xf32>
    %12 = math.tanh %11 : vector<8x128xf32>
    %c0_10 = arith.constant 0 : index
    %c0_11 = arith.constant 0 : index
    %13 = vector.load %arg5[%c0_10, %c0_11] : memref<128x128xf32, #tpu.memory_space<vmem>>, vector<128x128xf32>
    %c0_12 = arith.constant 0 : index
    %c0_13 = arith.constant 0 : index
    %14 = vector.load %arg6[%c0_12, %c0_13] : memref<1x128xf32, #tpu.memory_space<vmem>>, vector<1x128xf32>
    %cst_14 = arith.constant dense<0.000000e+00> : vector<8x128xf32>
    %15 = tpu.matmul %12, %13, %cst_14 {dimension_numbers = #tpu.dot_dimension_numbers<[1], [0], [0], [1], [0, 0, 1, 1], [], []>} : vector<8x128xf32>, vector<128x128xf32>, vector<8x128xf32> -> vector<8x128xf32>
    %16 = vector.broadcast %14 : vector<1x128xf32> to vector<8x128xf32>
    %17 = arith.addf %15, %16 : vector<8x128xf32>
    %c0_15 = arith.constant 0 : index
    %c0_16 = arith.constant 0 : index
    %18 = vector.load %arg7[%c0_15, %c0_16] : memref<8x128xf32, #tpu.memory_space<vmem>>, vector<8x128xf32>
    tpu.vector_store %arg7[%c0_15, %c0_16], %17 {strides = array<i32>} : memref<8x128xf32, #tpu.memory_space<vmem>>, vector<8x128xf32>,
    return
  }
}

</mosaic_0001>

<bundles_post_ra>
// kernel: feedforward_forward.1
= control target key start
LH: loop header
LB: loop body
LE: loop exit
PB: predicated region body
PF: predicated region fallthrough
CT: control target
= control target key end

     0   :  { %12 = vsyncpa [#allocation3], 0  ;;  %s814_s0 = inlined_call_operand.vmem [shape: f32[8,128], index: 0, kind: input, shape index: {}]   ;;  %s815_s1 = inlined_call_operand.hbm [shape: f32[128,128], index: 1, kind: input, shape index: {}]   ;;  %s816_s2 = inlined_call_operand.vmem [shape: f32[1,128], index: 2, kind: input, shape index: {}]   ;;  %s817_s3 = inlined_call_operand.hbm [shape: f32[128,128], index: 3, kind: input, shape index: {}]   ;;  %s818_s4 = inlined_call_operand.vmem [shape: f32[1,128], index: 4, kind: input, shape index: {}]   ;;  %s819_s5 = inlined_call_operand.hbm [shape: f32[128,128], index: 5, kind: input, shape index: {}]   ;;  %s820_s6 = inlined_call_operand.vmem [shape: f32[1,128], index: 6, kind: input, shape index: {}]   ;;  %s821_s7 = inlined_call_operand.vmem [shape: f32[8,128], index: 7, kind: output, shape index: {}]  }
   0x1   :  { %13 = vsyncpa [#allocation5], 0  ;;  %s669_s24 = smov [#allocation4]   ;;  %s670_s26 = smov [#allocation2]  }
   0x2   :  { %s35_s25 = sshll.u32 %s669_s24, 4  ;;  %s21_s27 = sshll.u32 %s670_s26, 4  ;;  %s36_s25 = int_to_ptr.vmem [resolvable:$true] %s35_s25  ;;  %s717_s27 = int_to_ptr.vmem [resolvable:$true] %s21_s27 }
   0x3   :  { %s599_s30 = scalar_lea.hbm %s817_s3, 2048 }
   0x4   :  { %p600_p0 = scmp.ne.s32.totalorder %s817_s3, %s599_s30  ;;  %p603_p1 = scmp.lt.u32.totalorder %s599_s30, %s817_s3 }
   0x6   :  { %p605_p2 = pnand %p603_p1, %p600_p0 }
   0x8   :  { %608 = shalt.err (!%p605_p2)
}
   0x9   :  { %s609_s12 = scalar_lea.vmem %s36_s25, 2048  ;;  %p614_p4 = scmp.lt.s32.totalorder %s36_s25, %s36_s25 }
   0xa   :  { %p610_p3 = scmp.ne.s32.totalorder %s36_s25, %s609_s12  ;;  %p615_p5 = scmp.lt.s32.totalorder %s609_s12, %s609_s12 }
   0xc   :  { %p616_p6 = por %p615_p5, %p614_p4 }
   0xe   :  { %p617_p7 = pnand %p616_p6, %p610_p3 }
  0x10   :  { %620 = shalt.err (!%p617_p7)
}
  0x11   :  { %s671_s13 = smov 128   ;;  %s672_s14 = smov 8  }
  0x12   :  { %41 = dma.hbm_to_vmem [thread:$0]  %s817_s3, 2048, %s36_s25, [#allocation5], %s671_s13, %s671_s13, %s672_s14  }
  0x13   :  { %s621_s19 = scalar_lea.hbm %s815_s1, 2048 }
  0x14   :  { %p622_p8 = scmp.ne.s32.totalorder %s815_s1, %s621_s19  ;;  %p625_p9 = scmp.lt.u32.totalorder %s621_s19, %s815_s1 }
  0x16   :  { %p627_p10 = pnand %p625_p9, %p622_p8 }
  0x18   :  { %630 = shalt.err (!%p627_p10)
}
  0x19   :  { %s631_s24 = scalar_lea.vmem %s717_s27, 2048  ;;  %p636_p12 = scmp.lt.s32.totalorder %s717_s27, %s717_s27 }
  0x1a   :  { %p632_p11 = scmp.ne.s32.totalorder %s717_s27, %s631_s24  ;;  %p637_p13 = scmp.lt.s32.totalorder %s631_s24, %s631_s24 }
  0x1c   :  { %p638_p0 = por %p637_p13, %p636_p12 }
  0x1e   :  { %p639_p1 = pnand %p638_p0, %p632_p11 }
  0x20   :  { %642 = shalt.err (!%p639_p1)
}
  0x21   :  { %27 = dma.hbm_to_vmem [thread:$0]  %s815_s1, 2048, %s717_s27, [#allocation3], %s671_s13, %s671_s13, %s672_s14  }
  0x22   :  { %s673_s26 = smov [#allocation6]   ;;  %s643_s8 = scalar_lea.hbm %s819_s5, 2048 }
  0x23   :  { %s49_s28 = sshll.u32 %s673_s26, 4  ;;  %p644_p2 = scmp.ne.s32.totalorder %s819_s5, %s643_s8  ;;  %s50_s28 = int_to_ptr.vmem [resolvable:$true] %s49_s28 }
  0x24   :  { %p647_p3 = scmp.lt.u32.totalorder %s643_s8, %s819_s5 }
  0x26   :  { %p649_p4 = pnand %p647_p3, %p644_p2 }
  0x28   :  { %652 = shalt.err (!%p649_p4)
}
  0x29   :  { %s653_s15 = scalar_lea.vmem %s50_s28, 2048  ;;  %p658_p6 = scmp.lt.s32.totalorder %s50_s28, %s50_s28 }
  0x2a   :  { %p654_p5 = scmp.ne.s32.totalorder %s50_s28, %s653_s15  ;;  %p659_p7 = scmp.lt.s32.totalorder %s653_s15, %s653_s15 }
  0x2c   :  { %p660_p8 = por %p659_p7, %p658_p6 }
  0x2e   :  { %p661_p9 = pnand %p660_p8, %p654_p5 }
  0x30   :  { %664 = shalt.err (!%p661_p9)
}
  0x31   :  { %55 = dma.hbm_to_vmem [thread:$0]  %s819_s5, 2048, %s50_s28, [#allocation5], %s671_s13, %s671_s13, %s672_s14  }
  0x32   :  { %665 = dma.done.wait [#allocation3], 2048  }
  0x33   :  { %666 = vsyncadd [#allocation3], 4294965248 }
  0x34   :  { %667 = dma.done.wait [#allocation5], 4096  }
  0x35   :  { %668 = vsyncadd [#allocation5], 4294963200  ;;  %v674_v0 = vmov 0.0|0.0   ;;  %vm675_vm0 = vmmov 0   ;;  %v676_v1 = vmov 0.0   ;;  %v68_v2 = vld [vmem:[#allocation2] sm:$0xff] }
  0x36   :  { %515 = vmatprep.subr.bf16.mxu0 %v674_v0  ;;  %442 = vmatprep.mubr.msk.f32.mxu0 %vm675_vm0, %v676_v1  ;;  %v69_v3 = vld [vmem:[#allocation2 + $0x8] sm:$0xff]  ;;  %v70_v4 = vld [vmem:[#allocation2 + $0x10] sm:$0xff]  ;;  %v71_v6 = vld [vmem:[#allocation2 + $0x18] sm:$0xff] }
  0x37   :  { %539 = vmatprep.subr.bf16.mxu1 %v674_v0  ;;  %477 = vmatprep.mubr.msk.f32.mxu1 %vm675_vm0, %v676_v1  ;;  %v516_v5 = vpack.c.bf16 %v69_v3, %v68_v2  ;;  %v519_v7 = vpack.c.bf16 %v71_v6, %v70_v4  ;;  %v72_v8 = vld [vmem:[#allocation2 + $0x20] sm:$0xff]  ;;  %v73_v9 = vld [vmem:[#allocation2 + $0x28] sm:$0xff]  ;;  %v164_v12 = vld [vmem:[#allocation4 + $0x10] sm:$0xff] }
  0x38   :  { %v162_v10 = vld [vmem:[#allocation4] sm:$0xff]  ;;  %v163_v11 = vld [vmem:[#allocation4 + $0x8] sm:$0xff]  ;;  %v165_v13 = vld [vmem:[#allocation4 + $0x18] sm:$0xff]  ;;  %v522_v14 = vpack.c.bf16 %v73_v9, %v72_v8 }
  0x39   :  { %517 = vmatpush3.bf16.msra.mxu0 %v516_v5  ;;  %v540_v15 = vpack.c.bf16 %v163_v11, %v162_v10  ;;  %v74_v16 = vld [vmem:[#allocation2 + $0x30] sm:$0xff]  ;;  %v75_v17 = vld [vmem:[#allocation2 + $0x38] sm:$0xff]  ;;  %v543_v18 = vpack.c.bf16 %v165_v13, %v164_v12  ;;  %v166_v19 = vld [vmem:[#allocation4 + $0x20] sm:$0xff] }
  0x3a   :  { %518 = vmatprep.subr.bf16.mxu0 %v674_v0  ;;  %v167_v20 = vld [vmem:[#allocation4 + $0x28] sm:$0xff]  ;;  %v525_v21 = vpack.c.bf16 %v75_v17, %v74_v16  ;;  %v76_v22 = vld [vmem:[#allocation2 + $0x40] sm:$0xff]  ;;  %v168_v25 = vld [vmem:[#allocation4 + $0x30] sm:$0xff] }
  0x3b   :  { %541 = vmatpush3.bf16.msra.mxu1 %v540_v15  ;;  %v77_v23 = vld [vmem:[#allocation2 + $0x48] sm:$0xff]  ;;  %v546_v24 = vpack.c.bf16 %v167_v20, %v166_v19  ;;  %v169_v26 = vld [vmem:[#allocation4 + $0x38] sm:$0xff]  ;;  %v78_v28 = vld [vmem:[#allocation2 + $0x50] sm:$0xff] }
  0x3c   :  { %542 = vmatprep.subr.bf16.mxu1 %v674_v0  ;;  %v528_v27 = vpack.c.bf16 %v77_v23, %v76_v22  ;;  %v79_v29 = vld [vmem:[#allocation2 + $0x58] sm:$0xff]  ;;  %v549_v30 = vpack.c.bf16 %v169_v26, %v168_v25  ;;  %v170_v31 = vld [vmem:[#allocation4 + $0x40] sm:$0xff]  ;;  %v171_v32 = vld [vmem:[#allocation4 + $0x48] sm:$0xff] }
  0x3d   :  { %520 = vmatpush3.bf16.msra.mxu0 %v519_v7  ;;  %v531_v33 = vpack.c.bf16 %v79_v29, %v78_v28  ;;  %v80_v34 = vld [vmem:[#allocation2 + $0x60] sm:$0xff]  ;;  %v81_v35 = vld [vmem:[#allocation2 + $0x68] sm:$0xff]  ;;  %v552_v36 = vpack.c.bf16 %v171_v32, %v170_v31  ;;  %v82_v38 = vld [vmem:[#allocation2 + $0x70] sm:$0xff] }
  0x3e   :  { %521 = vmatprep.subr.bf16.mxu0 %v674_v0  ;;  %v534_v37 = vpack.c.bf16 %v81_v35, %v80_v34  ;;  %v83_v39 = vld [vmem:[#allocation2 + $0x78] sm:$0xff]  ;;  %v67_v41 = vld [vmem:[%s814_s0] sm:$0xff]  ;;  %v172_v42 = vld [vmem:[#allocation4 + $0x50] sm:$0xff] }
  0x3f   :  { %544 = vmatpush3.bf16.msra.mxu1 %v543_v18  ;;  %v537_v40 = vpack.c.bf16 %v83_v39, %v82_v38  ;;  %v173_v43 = vld [vmem:[#allocation4 + $0x58] sm:$0xff]  ;;  %v174_v45 = vld [vmem:[#allocation4 + $0x60] sm:$0xff]  ;;  %v175_v46 = vld [vmem:[#allocation4 + $0x68] sm:$0xff] }
  0x40   :  { %545 = vmatprep.subr.bf16.mxu1 %v674_v0  ;;  %v555_v44 = vpack.c.bf16 %v173_v43, %v172_v42  ;;  %v558_v47 = vpack.c.bf16 %v175_v46, %v174_v45  ;;  %v176_v48 = vld [vmem:[#allocation4 + $0x70] sm:$0xff]  ;;  %v177_v49 = vld [vmem:[#allocation4 + $0x78] sm:$0xff]  ;;  %v256_v51 = vld [vmem:[#allocation6] sm:$0xff] }
  0x41   :  { %523 = vmatpush3.bf16.msra.mxu0 %v522_v14  ;;  %v561_v50 = vpack.c.bf16 %v177_v49, %v176_v48  ;;  %v257_v52 = vld [vmem:[#allocation6 + $0x8] sm:$0xff]  ;;  %v258_v53 = vld [vmem:[#allocation6 + $0x10] sm:$0xff]  ;;  %v259_v55 = vld [vmem:[#allocation6 + $0x18] sm:$0xff] }
  0x42   :  { %524 = vmatprep.subr.bf16.mxu0 %v674_v0  ;;  %v564_v54 = vpack.c.bf16 %v257_v52, %v256_v51  ;;  %v567_v56 = vpack.c.bf16 %v259_v55, %v258_v53  ;;  %v260_v57 = vld [vmem:[#allocation6 + $0x20] sm:$0xff]  ;;  %v261_v58 = vld [vmem:[#allocation6 + $0x28] sm:$0xff]  ;;  %v262_v60 = vld [vmem:[#allocation6 + $0x30] sm:$0xff] }
  0x43   :  { %547 = vmatpush3.bf16.msra.mxu1 %v546_v24  ;;  %v570_v59 = vpack.c.bf16 %v261_v58, %v260_v57  ;;  %v263_v61 = vld [vmem:[#allocation6 + $0x38] sm:$0xff]  ;;  %v264_v63 = vld [vmem:[#allocation6 + $0x40] sm:$0xff]  ;;  %v266_v8 = vld [vmem:[#allocation6 + $0x50] sm:$0xff] }
  0x44   :  { %548 = vmatprep.subr.bf16.mxu1 %v674_v0  ;;  %v573_v62 = vpack.c.bf16 %v263_v61, %v262_v60  ;;  %v356_v3 = vld [vmem:[%s816_s2] ss:$0 sm:$0xff]  ;;  %v267_v9 = vld [vmem:[#allocation6 + $0x58] sm:$0xff]  ;;  %v269_v12 = vld [vmem:[#allocation6 + $0x68] sm:$0xff] }
  0x45   :  { %526 = vmatpush3.bf16.msra.mxu0 %v525_v21  ;;  %v579_v10 = vpack.c.bf16 %v267_v9, %v266_v8  ;;  %v268_v11 = vld [vmem:[#allocation6 + $0x60] sm:$0xff]  ;;  %v270_v14 = vld [vmem:[#allocation6 + $0x70] sm:$0xff]  ;;  %v271_v15 = vld [vmem:[#allocation6 + $0x78] sm:$0xff] }
  0x46   :  { %527 = vmatprep.subr.bf16.mxu0 %v674_v0  ;;  %v582_v13 = vpack.c.bf16 %v269_v12, %v268_v11  ;;  %v585_v16 = vpack.c.bf16 %v271_v15, %v270_v14  ;;  %v357_v17 = vld [vmem:[%s818_s4] ss:$0 sm:$0xff] }
  0x47   :  { %550 = vmatpush3.bf16.msra.mxu1 %v549_v30  ;;  %v358_v22 = vld [vmem:[%s820_s6] ss:$0 sm:$0xff] }
  0x48   :  { %551 = vmatprep.subr.bf16.mxu1 %v674_v0 }
  0x49   :  { %529 = vmatpush3.bf16.msra.mxu0 %v528_v27 }
  0x4a   :  { %530 = vmatprep.subr.bf16.mxu0 %v674_v0 }
  0x4b   :  { %553 = vmatpush3.bf16.msra.mxu1 %v552_v36 }
  0x4c   :  { %554 = vmatprep.subr.bf16.mxu1 %v674_v0 }
  0x4d   :  { %532 = vmatpush3.bf16.msra.mxu0 %v531_v33 }
  0x4e   :  { %533 = vmatprep.subr.bf16.mxu0 %v674_v0 }
  0x4f   :  { %556 = vmatpush3.bf16.msra.mxu1 %v555_v44 }
  0x50   :  { %557 = vmatprep.subr.bf16.mxu1 %v674_v0 }
  0x51   :  { %535 = vmatpush3.bf16.msra.mxu0 %v534_v37 }
  0x52   :  { %536 = vmatprep.subr.bf16.mxu0 %v674_v0 }
  0x53   :  { %559 = vmatpush3.bf16.msra.mxu1 %v558_v47 }
  0x54   :  { %560 = vmatprep.subr.bf16.mxu1 %v674_v0 }
  0x55   :  { %538 = vmatpush3.bf16.msra.mxu0 %v537_v40 }
  0x56   :  { %563 = vmatprep.subr.bf16.mxu0 %v674_v0 }
  0x57   :  { %562 = vmatpush3.bf16.msra.mxu1 %v561_v50 }
  0x58   :  { %443 = vmatmul.mubr.f32.vlgmr.msra.gmra.mrb[0].mxu0 %v67_v41 }
  0x59   :  { %512 = vmatprep.mubr.msk.f32.mxu0 %vm675_vm0, %v676_v1  ;;  %565 = vmatpush3.bf16.msra.mxu0 %v564_v54  ;;  %v265_v1 = vld [vmem:[#allocation6 + $0x48] sm:$0xff] }
  0x5a   :  { %566 = vmatprep.subr.bf16.mxu0 %v674_v0  ;;  %v576_v2 = vpack.c.bf16 %v265_v1, %v264_v63 }
  0x5d   :  { %568 = vmatpush3.bf16.msra.mxu0 %v567_v56 }
  0x5e   :  { %569 = vmatprep.subr.bf16.mxu0 %v674_v0 }
  0x61   :  { %571 = vmatpush3.bf16.msra.mxu0 %v570_v59 }
  0x62   :  { %572 = vmatprep.subr.bf16.mxu0 %v674_v0 }
  0x65   :  { %574 = vmatpush3.bf16.msra.mxu0 %v573_v62 }
  0x66   :  { %575 = vmatprep.subr.bf16.mxu0 %v674_v0 }
  0x69   :  { %577 = vmatpush3.bf16.msra.mxu0 %v576_v2 }
  0x6a   :  { %578 = vmatprep.subr.bf16.mxu0 %v674_v0 }
  0x6d   :  { %580 = vmatpush3.bf16.msra.mxu0 %v579_v10 }
  0x6e   :  { %581 = vmatprep.subr.bf16.mxu0 %v674_v0 }
  0x71   :  { %583 = vmatpush3.bf16.msra.mxu0 %v582_v13 }
  0x72   :  { %584 = vmatprep.subr.bf16.mxu0 %v674_v0 }
  0x75   :  { %586 = vmatpush3.bf16.msra.mxu0 %v585_v16 }
 0x12b   :  { %v157_v4 = vpop.f32.mrb[0].mxu0 }
 0x12c   :  { %v158_v5 = vadd.f32 %v356_v3, %v157_v4  ;;  %v444_v6 = vpop.f32.mrb[1].mxu0 }
 0x12e   :  { %595 = vtanh.f32 %v158_v5 }
 0x138   :  { %v596_v7 = vpop.eup %595 }
 0x139   :  { %478 = vmatmul.mubr.f32.vlgmr.msra.gmra.mrb[0].mxu1 %v596_v7 }
 0x20c   :  { %v251_v18 = vpop.f32.mrb[0].mxu1 }
 0x20d   :  { %v252_v19 = vadd.f32 %v357_v17, %v251_v18  ;;  %v479_v20 = vpop.f32.mrb[1].mxu1 }
 0x20f   :  { %597 = vtanh.f32 %v252_v19 }
 0x219   :  { %v598_v21 = vpop.eup %597 }
 0x21a   :  { %513 = vmatmul.mubr.f32.vlgmr.msra.gmra.mrb[2].mxu0 %v598_v21 }
 0x2ed   :  { %v345_v23 = vpop.f32.mrb[2].mxu0 }
 0x2ee   :  { %v346_v24 = vadd.f32 %v358_v22, %v345_v23  ;;  %v514_v25 = vpop.f32.mrb[3].mxu0 }
 0x2f0   :  { %349 = vst [vmem:[%s821_s7] sm:$0xff] %v346_v24 }
 0x2f1   :  { %354 = vsyncpa [#allocation3], 1 }
 0x2f2   :  { %355 = vsyncpa [#allocation5], 1 }

</bundles_post_ra>
